<compile_context>
chip_gen: v7x
topology: tpu7x:2x2x1
jax: 0.10.0
libtpu: 0.0.40
codegen_flags: <defaults>
</compile_context>

<pallas_src>
import jax
import jax.numpy as jnp
from jax.experimental import pallas as pl
from jax.experimental.pallas import tpu as pltpu

_LANE = 128


def _pad_to_lanes(n: int) -> int:
    return ((n + _LANE - 1) // _LANE) * _LANE


def make_fused_weight(w_linear, w_periodic):
    """Fuse + transpose + lane-pad the two PyTorch-style (out,in)=(T,T) weights
    ONCE, outside the hot path.

    Result: (T, n_pad) f32 where columns [0,T)=linear, [T,2T)=periodic,
    [2T,n_pad)=zeros (lane padding to a multiple of 128)."""
    T = w_linear.shape[0]
    n_pad = _pad_to_lanes(2 * T)
    w = jnp.concatenate([w_linear.T, w_periodic.T], axis=1)        # (T, 2T)
    return jnp.pad(w, ((0, 0), (0, n_pad - 2 * T)))                # (T, n_pad)


def time2vector_kernel(x_ref, w_ref, out_ref):
    x = x_ref[...]                      # (block_b, T)
    w = w_ref[...]                      # (T, n_pad): canonical RHS, resident
    T = x_ref.shape[1]

    # Canonical [M,K]x[K,N] MXU matmul -> (block_b, n_pad), f32 accumulation.
    z = jax.lax.dot_general(
        x, w, (((1,), (0,)), ((), ())),
        preferred_element_type=jnp.float32)

    # sin only on the periodic half (lanes >= T).  Pad lanes [2T, n_pad) carry
    # zeros from the zero weight columns and sin(0) == 0, so they stay zero.
    lane = jax.lax.broadcasted_iota(jnp.int32, z.shape, dimension=1)
    z = jnp.where(lane >= T, jnp.sin(z), z)

    # Single lane-dense, UNMASKED full-vreg store (n_pad is a multiple of 128).
    out_ref[...] = z.astype(out_ref.dtype)


def time2vector_pallas(x, w_fused, *, block_b=None):
    """Pallas path.  x: (B, T) f32, w_fused: (T, n_pad) f32 from make_fused_weight.
    Returns the padded lane-dense slab (B, n_pad): [:, :T]=linear,
    [:, T:2T]=sin-periodic, [:, 2T:]=zeros."""
    B, T = x.shape
    Tw, n_pad = w_fused.shape
    assert Tw == T and n_pad % _LANE == 0 and n_pad >= 2 * T

    if block_b is None:
        # Tiny/medium B: one full-array block (single grid step).
        # Large B: 4096-row tiles -> ~6 MiB of double-buffered x+out tiles
        # (safe under v5e's 16 MiB scoped VMEM and v6e/v7x defaults), >=2
        # parallel grid steps so v7x megacore sharding is real, and well into
        # the ~85%-of-HBM-roofline tile regime.
        block_b = B if B <= 1024 else 4096
    block_b = min(block_b, B)

    grid = (pl.cdiv(B, block_b),)

    cost = pl.CostEstimate(
        flops=2 * B * T * n_pad,
        transcendentals=B * T,
        bytes_accessed=4 * (B * T + T * n_pad + B * n_pad),
    )

    return pl.pallas_call(
        time2vector_kernel,
        out_shape=jax.ShapeDtypeStruct((B, n_pad), jnp.float32),
        grid=grid,
        in_specs=[
            pl.BlockSpec((block_b, T), lambda i: (i, 0)),     # x row tile
            pl.BlockSpec((T, n_pad), lambda i: (0, 0)),       # fused weight, resident
        ],
        out_specs=pl.BlockSpec((block_b, n_pad), lambda i: (i, 0)),
        compiler_params=pltpu.CompilerParams(
            dimension_semantics=("parallel",)),
        cost_estimate=cost,
    )(x, w_fused)


# Below ~this many rows, pallas_call fixed cost (dispatch + DMA setup + one
# grid step) dwarfs the <1 KB of data moved; let XLA fuse the plain expression.
_PALLAS_MIN_BATCH = 512


def time2vector_slab(x, w_fused, *, force_pallas=False):
    """Dispatcher: returns the padded (B, n_pad) slab via Pallas for large B,
    via fused XLA for tiny B (unless force_pallas)."""
    B, T = x.shape
    if force_pallas or B >= _PALLAS_MIN_BATCH:
        return time2vector_pallas(x, w_fused)
    z = x @ w_fused                                            # (B, n_pad)
    lane = jnp.arange(z.shape[1])[None, :]
    return jnp.where(lane >= T, jnp.sin(z), z)


def slab_to_torch_layout(slab, T):
    """(B, n_pad) slab -> torch-compatible (B, T, 2).  Only call this at the
    FINAL consumer that truly needs the last-dim-2 layout; the relayout can
    cost more than the kernel itself."""
    B = slab.shape[0]
    return jnp.swapaxes(slab[:, :2 * T].reshape(B, 2, T), 1, 2)


if __name__ == "__main__":
    block_size = 60   # T (from the module's globals)
    batch = 2         # B

    key = jax.random.PRNGKey(0)
    kx, kl, kp = jax.random.split(key, 3)

    # Deterministic params, same shapes as nn.Linear(block_size, block_size,
    # bias=False) with PyTorch-default uniform(-1/sqrt(in), 1/sqrt(in)).
    bound = 1.0 / jnp.sqrt(jnp.float32(block_size))
    w_linear = jax.random.uniform(
        kl, (block_size, block_size), jnp.float32, -bound, bound)
    w_periodic = jax.random.uniform(
        kp, (block_size, block_size), jnp.float32, -bound, bound)

    x = jax.random.normal(kx, (batch, block_size), jnp.float32)

    # Weight fusion / transpose / lane-padding happens ONCE here.
    w_fused = make_fused_weight(w_linear, w_periodic)          # (60, 128)

    # Force the Pallas path so the kernel is actually exercised at demo size
    # (the dispatcher would otherwise route B=2 to fused XLA).
    slab = time2vector_slab(x, w_fused, force_pallas=True)     # (B, 128)
    slab = jax.block_until_ready(slab)

    # Pure-JAX reference of the PyTorch forward semantics.
    ref_lin = x @ w_linear.T
    ref_per = jnp.sin(x @ w_periodic.T)
    ref = jnp.stack([ref_lin, ref_per], axis=-1)               # (B, T, 2)

    # Check the lane-dense slab directly (hot-path format)...
    assert slab.shape == (batch, 128)
    assert jnp.allclose(slab[:, :block_size], ref_lin, atol=1e-5, rtol=1e-5)
    assert jnp.allclose(slab[:, block_size:2 * block_size], ref_per,
                        atol=1e-5, rtol=1e-5)
    assert jnp.allclose(slab[:, 2 * block_size:], 0.0)
    # ...and the torch-compatible view produced only at the final consumer.
    out = slab_to_torch_layout(slab, block_size)
    assert out.shape == (batch, block_size, 2)
    assert jnp.allclose(out, ref, atol=1e-5, rtol=1e-5)

    # Also sanity-check the tiny-B XLA fallback path matches.
    slab_xla = time2vector_slab(x, w_fused)
    assert jnp.allclose(slab_xla, slab, atol=1e-5, rtol=1e-5)

    print("KERNEL_OK")
</pallas_src>

<mosaic_0001>
module attributes {stable_mosaic.version = 11 : i64} {
  func.func @time2vector_kernel(%arg0: i32, %arg1: memref<2x60xf32, #tpu.memory_space<vmem>>, %arg2: memref<60x128xf32, #tpu.memory_space<vmem>>, %arg3: memref<2x128xf32, #tpu.memory_space<vmem>>) attributes {dimension_semantics = [#tpu.dimension_semantics<parallel>], iteration_bounds = array<i64: 1>, scalar_prefetch = 0 : i64, scratch_operands = 0 : i64, tpu.core_type = #tpu.core_type<tc>, window_params = [{transform_indices = @transform_0, window_bounds = array<i64: 2, 60>}, {pipeline_mode = #tpu.pipeline_mode<synchronous>, transform_indices = @transform_1, window_bounds = array<i64: 60, 128>}, {transform_indices = @transform_2, window_bounds = array<i64: 2, 128>}]} {
    %c0 = arith.constant 0 : index
    %c0_0 = arith.constant 0 : index
    %0 = vector.load %arg1[%c0, %c0_0] : memref<2x60xf32, #tpu.memory_space<vmem>>, vector<2x60xf32>
    %c0_1 = arith.constant 0 : index
    %c0_2 = arith.constant 0 : index
    %1 = vector.load %arg2[%c0_1, %c0_2] : memref<60x128xf32, #tpu.memory_space<vmem>>, vector<60x128xf32>
    %cst = arith.constant dense<0.000000e+00> : vector<2x128xf32>
    %2 = tpu.matmul %0, %1, %cst {dimension_numbers = #tpu.dot_dimension_numbers<[1], [0], [0], [1], [0, 0, 1, 1], [], []>} : vector<2x60xf32>, vector<60x128xf32>, vector<2x128xf32> -> vector<2x128xf32>
    %3 = tpu.iota {dimensions = array<i32: 1>} : vector<2x128xi32>
    %c60_i32 = arith.constant 60 : i32
    %4 = vector.broadcast %c60_i32 : i32 to vector<2x128xi32>
    %5 = arith.cmpi sge, %3, %4 : vector<2x128xi32>
    %6 = math.sin %2 : vector<2x128xf32>
    %7 = arith.select %5, %6, %2 : vector<2x128xi1>, vector<2x128xf32>
    %c0_3 = arith.constant 0 : index
    %c0_4 = arith.constant 0 : index
    %8 = vector.load %arg3[%c0_3, %c0_4] : memref<2x128xf32, #tpu.memory_space<vmem>>, vector<2x128xf32>
    tpu.vector_store %arg3[%c0_3, %c0_4], %7 {strides = array<i32>} : memref<2x128xf32, #tpu.memory_space<vmem>>, vector<2x128xf32>,
    return
  }
  func.func @transform_0(%arg0: i32) -> (i32, i32) {
    %c0_i32 = arith.constant 0 : i32
    %c0_i32_0 = arith.constant 0 : i32
    return %arg0, %c0_i32 : i32, i32
  }
  func.func @transform_1(%arg0: i32) -> (i32, i32) {
    %c0_i32 = arith.constant 0 : i32
    %c0_i32_0 = arith.constant 0 : i32
    %c0_i32_1 = arith.constant 0 : i32
    return %c0_i32, %c0_i32_0 : i32, i32
  }
  func.func @transform_2(%arg0: i32) -> (i32, i32) {
    %c0_i32 = arith.constant 0 : i32
    %c0_i32_0 = arith.constant 0 : i32
    return %arg0, %c0_i32 : i32, i32
  }
}

</mosaic_0001>

<bundles_post_ra>
// kernel: tpu_custom_call.1
= control target key start
LH: loop header
LB: loop body
LE: loop exit
PB: predicated region body
PF: predicated region fallthrough
CT: control target
= control target key end

     0   :  { %7 = vsyncpa [#allocation3], 0  ;;  %s487_s0 = inlined_call_operand.hbm [shape: f32[2,60], index: 0, kind: input, shape index: {}]   ;;  %s488_s1 = inlined_call_operand.hbm [shape: f32[60,128], index: 1, kind: input, shape index: {}]   ;;  %s489_s2 = inlined_call_operand.hbm [shape: f32[2,128], index: 2, kind: output, shape index: {}]  }
   0x1   :  { %8 = vsyncpa [#allocation6], 0 }
   0x2   :  { %9 = vsyncpa [#allocation4], 0  ;;  %s392_s9 = smov [#allocation2]   ;;  %s393_s11 = smov [#allocation5]  }
   0x3   :  { %s16_s10 = sshll.u32 %s392_s9, 4  ;;  %s25_s12 = sshll.u32 %s393_s11, 4  ;;  %s17_s10 = int_to_ptr.vmem [resolvable:$true] %s16_s10  ;;  %s422_s12 = int_to_ptr.vmem [resolvable:$true] %s25_s12 }
   0x4   :  { %s320_s15 = scalar_lea.hbm %s487_s0, 32 }
   0x5   :  { %p321_p0 = scmp.ne.s32.totalorder %s487_s0, %s320_s15  ;;  %p324_p1 = scmp.lt.u32.totalorder %s320_s15, %s487_s0 }
   0x7   :  { %p326_p2 = pnand %p324_p1, %p321_p0 }
   0x9   :  { %329 = shalt.err (!%p326_p2)
}
   0xa   :  { %s330_s20 = scalar_lea.vmem %s17_s10, 32  ;;  %p335_p4 = scmp.lt.s32.totalorder %s17_s10, %s17_s10 }
   0xb   :  { %p331_p3 = scmp.ne.s32.totalorder %s17_s10, %s330_s20  ;;  %p336_p5 = scmp.lt.s32.totalorder %s330_s20, %s330_s20 }
   0xd   :  { %p337_p6 = por %p336_p5, %p335_p4 }
   0xf   :  { %p338_p7 = pnand %p337_p6, %p331_p3 }
  0x11   :  { %341 = shalt.err (!%p338_p7)
}
  0x12   :  { %19 = dma.hbm_to_vmem [thread:$0]  %s487_s0, 32, %s17_s10, [#allocation3]  }
  0x13   :  { %s342_s25 = scalar_lea.hbm %s488_s1, 1024 }
  0x14   :  { %p343_p8 = scmp.ne.s32.totalorder %s488_s1, %s342_s25  ;;  %p346_p9 = scmp.lt.u32.totalorder %s342_s25, %s488_s1 }
  0x16   :  { %p348_p10 = pnand %p346_p9, %p343_p8 }
  0x18   :  { %351 = shalt.err (!%p348_p10)
}
  0x19   :  { %s352_s30 = scalar_lea.vmem %s422_s12, 1024  ;;  %p357_p12 = scmp.lt.s32.totalorder %s422_s12, %s422_s12 }
  0x1a   :  { %p353_p11 = scmp.ne.s32.totalorder %s422_s12, %s352_s30  ;;  %p358_p13 = scmp.lt.s32.totalorder %s352_s30, %s352_s30 }
  0x1c   :  { %p359_p0 = por %p358_p13, %p357_p12 }
  0x1e   :  { %p360_p1 = pnand %p359_p0, %p353_p11 }
  0x20   :  { %363 = shalt.err (!%p360_p1)
}
  0x21   :  { %s394_s0 = smov 128   ;;  %s395_s3 = smov 8  }
  0x22   :  { %31 = dma.hbm_to_vmem [thread:$0]  %s488_s1, 1024, %s422_s12, [#allocation6], %s394_s0, %s394_s0, %s395_s3  }
  0x23   :  { %386 = dma.done.wait [#allocation3], 32  }
  0x24   :  { %387 = vsyncadd [#allocation3], 4294967264 }
  0x25   :  { %388 = dma.done.wait [#allocation6], 1024  }
  0x26   :  { %389 = vsyncadd [#allocation6], 4294966272  ;;  %v396_v0 = vmov 0.0|0.0   ;;  %vm397_vm0 = vmmov 0   ;;  %v398_v1 = vmov 0.0   ;;  %v39_v2 = vld [vmem:[#allocation5] sm:$0xff] }
  0x27   :  { %284 = vmatprep.subr.bf16.mxu0 %v396_v0  ;;  %281 = vmatprep.mubr.msk.f32.mxu0 %vm397_vm0, %v398_v1  ;;  %v40_v3 = vld [vmem:[#allocation5 + $0x8] sm:$0xff]  ;;  %v41_v4 = vld [vmem:[#allocation5 + $0x10] sm:$0xff]  ;;  %v42_v6 = vld [vmem:[#allocation5 + $0x18] sm:$0xff]  ;;  %vm51_vm1 = vcmask 1043456   ;;  %vm399_vm2 = vmmov 1   ;;  %vm47_vm4 = vcmask 490496  }
  0x28   :  { %v285_v5 = vpack.c.bf16 %v40_v3, %v39_v2  ;;  %v288_v7 = vpack.c.bf16 %v42_v6, %v41_v4  ;;  %v43_v8 = vld [vmem:[#allocation5 + $0x20] sm:$0xff]  ;;  %v44_v9 = vld [vmem:[#allocation5 + $0x28] sm:$0xff]  ;;  %v45_v11 = vld [vmem:[#allocation5 + $0x30] sm:$0xff]  ;;  %v400_v27 = vmov 683565275   ;;  %s406_s1 = smov [#allocation7]  }
  0x29   :  { %v291_v10 = vpack.c.bf16 %v44_v9, %v43_v8  ;;  %v46_v12 = vld [vmem:[#allocation5 + $0x38] sm:$0xf]  ;;  %vm295_vm3 = vmpackc.low %vm51_vm1, %vm399_vm2  ;;  %v38_v14 = vld [vmem:[#allocation2] sm:$0x3]  ;;  %v401_v29 = vmov 2475754826  }
  0x2a   :  { %286 = vmatpush3.bf16.msra.mxu0 %v285_v5  ;;  %v294_v13 = vpack.c.bf16 %v46_v12, %v45_v11  ;;  %v402_v32 = vmov 2131351028   ;;  %v403_v35 = vmov 2102212464   ;;  %v404_v38 = vmov 920167782  }
  0x2b   :  { %287 = vmatprep.subr.bf16.mxu0 %v396_v0  ;;  %v405_v41 = vmov 1326507024   ;;  %s240_s6 = sshll.u32 %s406_s1, 4  ;;  %s241_s6 = int_to_ptr.vmem [resolvable:$true] %s240_s6 }
  0x2c   :  { %s364_s7 = scalar_lea.vmem %s241_s6, 32  ;;  %p369_p3 = scmp.lt.s32.totalorder %s241_s6, %s241_s6 }
  0x2d   :  { %p365_p2 = scmp.ne.s32.totalorder %s241_s6, %s364_s7  ;;  %p370_p4 = scmp.lt.s32.totalorder %s364_s7, %s364_s7 }
  0x2e   :  { %289 = vmatpush3.bf16.msra.mxu0 %v288_v7 }
  0x2f   :  { %290 = vmatprep.subr.bf16.mxu0 %v396_v0  ;;  %p371_p5 = por %p370_p4, %p369_p3 }
  0x31   :  { %p372_p6 = pnand %p371_p5, %p365_p2 }
  0x32   :  { %292 = vmatpush3.bf16.msra.mxu0 %v291_v10 }
  0x33   :  { %293 = vmatprep.subr.bf16.mxu0 %v396_v0 }
  0x36   :  { %296 = vmatpush3.bf16.msk.msra.mxu0 %vm295_vm3, %v294_v13 }
  0x39   :  { %282 = vmatmul.mubr.msk.f32.vlgmr.msra.gmra.mrb[0].mxu0 %vm47_vm4, %v38_v14 }
 0x10c   :  { %v453_v15 = vpop.f32.mrb[0].mxu0 }
 0x10d   :  { %v131_v16 = vand.u32 2139095040, %v453_v15  ;;  %v283_v17 = vpop.f32.mrb[1].mxu0  ;;  %v128_v21 = vand.u32 2147483647, %v453_v15  ;;  %vm130_vm12 = vcmp.lt.s32.totalorder %v453_v15, 0  ;;  %vm220_vm2 = vweird.f32 %v453_v15 }
 0x10f   :  { %v132_v18 = vshrl.u32 %v131_v16, 23  ;;  %v135_v24 = vand.u32 8388607, %v128_v21  ;;  %vm129_vm13 = vcmp.le.f32.partialorder %v128_v21, 0.7853982 }
 0x111   :  { %v252_v19 = vadd.s32 4294967169, %v132_v18  ;;  %v136_v43 = vor.u32 8388608, %v135_v24 }
 0x113   :  { %v138_v20 = vadd.s32 1, %v252_v19  ;;  %v176_v57 = vshll.u32 %v136_v43, 8 }
 0x115   :  { %vm139_vm5 = vcmp.gt.s32.totalorder %v138_v20, 0 }
 0x116   :  { %v140_v22 = vsel %vm139_vm5, %v138_v20, 0 }
 0x117   :  { %v142_v23 = vand.u32 31, %v140_v22  ;;  %v141_v26 = vshrl.u32 %v140_v22, 5 }
 0x119   :  { %v143_v25 = vsub.s32 32, %v142_v23  ;;  %v145_v28 = vshll.u32 %v400_v27, %v142_v23  ;;  %v148_v30 = vshll.u32 %v401_v29, %v142_v23  ;;  %v151_v34 = vshll.u32 %v402_v32, %v142_v23 }
 0x11a   :  { %v154_v37 = vshll.u32 %v403_v35, %v142_v23  ;;  %v157_v40 = vshll.u32 %v404_v38, %v142_v23  ;;  %vm160_vm6 = vcmp.lt.s32.totalorder %v141_v26, 1  ;;  %vm163_vm7 = vcmp.lt.s32.totalorder %v141_v26, 4 }
 0x11b   :  { %v146_v31 = vshrl.u32 %v401_v29, %v143_v25  ;;  %v149_v33 = vshrl.u32 %v402_v32, %v143_v25  ;;  %v152_v36 = vshrl.u32 %v403_v35, %v143_v25  ;;  %v155_v39 = vshrl.u32 %v404_v38, %v143_v25 }
 0x11c   :  { %v158_v42 = vshrl.u32 %v405_v41, %v143_v25  ;;  %v144_v52 = vshrl.u32 %v400_v27, %v143_v25  ;;  %vm162_vm8 = vcmp.lt.s32.totalorder %v141_v26, 3  ;;  %vm161_vm9 = vcmp.lt.s32.totalorder %v141_v26, 2 }
 0x11d   :  { %v147_v44 = vor.u32 %v146_v31, %v145_v28  ;;  %v150_v45 = vor.u32 %v149_v33, %v148_v30  ;;  %v153_v46 = vor.u32 %v152_v36, %v151_v34  ;;  %v156_v47 = vor.u32 %v155_v39, %v154_v37 }
 0x11e   :  { %v159_v48 = vor.u32 %v158_v42, %v157_v40  ;;  %v125_v37 = vlaneseq }
 0x11f   :  { %v165_v49 = vsel %vm163_vm7, %v153_v46, 2102212464  ;;  %v168_v50 = vsel %vm160_vm6, %v147_v44, %v150_v45  ;;  %v172_v51 = vsel %vm160_vm6, %v150_v45, %v153_v46  ;;  %v169_v53 = vsel %vm163_vm7, %v156_v47, 920167782 }
 0x120   :  { %v173_v54 = vsel %vm163_vm7, %v159_v48, 1326507024  ;;  %v170_v55 = vsel %vm162_vm8, %v153_v46, %v169_v53  ;;  %v164_v58 = vsel %vm160_vm6, %v144_v52, %v147_v44  ;;  %v166_v59 = vsel %vm162_vm8, %v150_v45, %v165_v49 }
 0x121   :  { %v174_v56 = vsel %vm162_vm8, %v156_v47, %v173_v54  ;;  %v171_v60 = vsel %vm161_vm9, %v168_v50, %v170_v55  ;;  %v167_v2 = vsel %vm161_vm9, %v164_v58, %v166_v59  ;;  %v126_v40 = vand.u32 127, %v125_v37 }
 0x122   :  { %v175_v61 = vsel %vm161_vm9, %v172_v51, %v174_v56  ;;  %v462_v0 = vmul.u32.u64.low %v176_v57, %v171_v60  ;;  %v463_v1 = vmul.u32.u64.high %v176_v57, %v171_v60, %v462_v0  ;;  %v183_v4 = vmul.u32 %v176_v57, %v167_v2 }
 0x123   :  { %v459_v62 = vmul.u32.u64.low %v176_v57, %v175_v61  ;;  %v460_v63 = vmul.u32.u64.high %v176_v57, %v175_v61, %v459_v62  ;;  %vm127_vm0 = vcmp.ge.s32.totalorder %v126_v40, 60 }
 0x124   :  { %v186_v3 = vadd.s32 1, %v463_v1 }
 0x125   :  { %vm185_vm10 = vc.u32 %v460_v63, %v462_v0  ;;  %v184_v17 = vadd.s32 %v462_v0, %v460_v63 }
 0x126   :  { %v187_v5 = vsel %vm185_vm10, %v186_v3, %v463_v1 }
 0x127   :  { %v188_v6 = vadd.s32 %v187_v5, %v183_v4 }
 0x129   :  { %v189_v7 = vadd.s32 536870912, %v188_v6 }
 0x12b   :  { %v190_v8 = vshrl.u32 %v189_v7, 30 }
 0x12d   :  { %v191_v9 = vshll.u32 %v190_v8, 30  ;;  %v214_v30 = vsub.s32 4, %v190_v8 }
 0x12f   :  { %v192_v10 = vsub.s32 %v188_v6, %v191_v9  ;;  %v215_v33 = vsel %vm130_vm12, %v214_v30, %v190_v8 }
 0x130   :  { %v217_v35 = vsel %vm129_vm13, 0, %v215_v33 }
 0x131   :  { %v194_v11 = vsub.s32 0, %v192_v10  ;;  %v221_v36 = vadd.s32 3, %v217_v35 }
 0x133   :  { %v253_v12 = vmin.u32 %v194_v11, %v192_v10  ;;  %v222_v38 = vand.u32 3, %v221_v36 }
 0x135   :  { %v196_v13 = vclz %v253_v12  ;;  %vm227_vm14 = vcmp.eq.s32.totalorder %v222_v38, 2  ;;  %vm224_vm15 = vcmp.eq.s32.totalorder %v222_v38, 0  ;;  %vm223_vm1 = vcmp.lt.s32.totalorder %v222_v38, 2 }
 0x137   :  { %v254_v14 = vadd.s32 4294967294, %v196_v13 }
 0x139   :  { %vm255_vm11 = vcmp.lt.s32.totalorder %v254_v14, 0 }
 0x13a   :  { %v199_v16 = vsel %vm255_vm11, 0, %v254_v14 }
 0x13b   :  { %v200_v18 = vsub.s32 32, %v199_v16  ;;  %v204_v19 = vsub.s32 4294967266, %v199_v16  ;;  %v201_v20 = vshll.u32 %v192_v10, %v199_v16 }
 0x13d   :  { %v202_v22 = vshrl.u32 %v184_v17, %v200_v18  ;;  %v205_v23 = vadd.s32 127, %v204_v19 }
 0x13f   :  { %v203_v24 = vor.u32 %v202_v22, %v201_v20  ;;  %v206_v25 = vshll.u32 %v205_v23, 23 }
 0x141   :  { %v207_v26 = vor.u32 4788187, %v206_v25  ;;  %v210_v28 = vcvt.s32.f32 %v203_v24 }
 0x143   :  { %v208_v27 = vand.u32 2147483647, %v207_v26 }
 0x145   :  { %v211_v29 = vmul.f32 %v210_v28, %v208_v27 }
 0x147   :  { %v212_v31 = vxor.u32 2147483648, %v211_v29 }
 0x149   :  { %v213_v32 = vsel %vm130_vm12, %v212_v31, %v211_v29 }
 0x14a   :  { %v216_v34 = vsel %vm129_vm13, %v453_v15, %v213_v32 }
 0x14b   :  { %316 = vcosq.f32 %v216_v34 }
 0x14c   :  { %318 = vsinq.f32 %v216_v34 }
 0x155   :  { %v317_v39 = vpop.eup %316 }
 0x156   :  { %v319_v41 = vpop.eup %318  ;;  %v228_v42 = vxor.u32 2147483648, %v317_v39 }
 0x157   :  { %v225_v43 = vxor.u32 2147483648, %v319_v41 }
 0x158   :  { %v229_v44 = vsel %vm227_vm14, %v228_v42, %v319_v41 }
 0x159   :  { %v226_v21 = vsel %vm224_vm15, %v317_v39, %v225_v43 }
 0x15a   :  { %v230_v45 = vsel %vm223_vm1, %v226_v21, %v229_v44 }
 0x15b   :  { %v231_v46 = vsel %vm220_vm2, nan, %v230_v45 }
 0x15c   :  { %v232_v47 = vsel %vm127_vm0, %v231_v46, %v453_v15 }
 0x15d   :  { %233 = vst [vmem:[#allocation7] sm:$0x3] %v232_v47 }
 0x15e   :  { %375 = shalt.err (!%p372_p6)
}
 0x15f   :  { %s376_s10 = scalar_lea.hbm %s489_s2, 32 }
 0x160   :  { %p377_p7 = scmp.ne.s32.totalorder %s489_s2, %s376_s10  ;;  %p380_p8 = scmp.lt.u32.totalorder %s376_s10, %s489_s2 }
 0x162   :  { %p382_p9 = pnand %p380_p8, %p377_p7 }
 0x164   :  { %385 = shalt.err (!%p382_p9)
}
 0x165   :  { %243 = dma.vmem_to_hbm [thread:$0]  %s241_s6, 32, %s489_s2, [#allocation4]  }
 0x166   :  { %390 = dma.done.wait [#allocation4], 32  }
 0x167   :  { %391 = vsyncadd [#allocation4], 4294967264 }
 0x168   :  { %247 = vsyncpa [#allocation3], 1 }
 0x169   :  { %248 = vsyncpa [#allocation6], 1 }
 0x16a   :  { %249 = vsyncpa [#allocation4], 1 }

</bundles_post_ra>
